<compile_context>
chip_gen: v6e
topology: v6e:2x2x1
jax: 0.10.0
libtpu: 0.0.40
codegen_flags: <defaults>
</compile_context>

<pallas_src>
import jax
import jax.numpy as jnp
from jax.experimental import pallas as pl
from jax.experimental.pallas import tpu as pltpu


def _round_up(n: int, m: int) -> int:
    return ((n + m - 1) // m) * m


def ffn_kernel(x_ref, w1_ref, b1_ref, w2_ref, b2_ref, o_ref, acc_ref):
    # x_ref:   (tile_m, d_model_p)          — row tile, resident across k axis
    # w1_ref:  (d_model_p, tile_k)          — d_ff chunk of W1
    # b1_ref:  (1, tile_k)
    # w2_ref:  (tile_k, d_model_p)          — d_ff chunk of W2
    # b2_ref:  (1, d_model_p)
    # acc_ref: (tile_m, d_model_p) f32 scratch accumulator
    k = pl.program_id(1)

    @pl.when(k == 0)
    def _():
        acc_ref[...] = jnp.zeros_like(acc_ref)

    # First matmul: MXU accumulates in f32; inputs stay in their native dtype.
    h = jnp.dot(x_ref[...], w1_ref[...], preferred_element_type=jnp.float32)
    h = jnp.maximum(h + b1_ref[...].astype(jnp.float32), 0.0)  # bias + ReLU in f32
    # TODO(synk): dropout omitted (eval-mode identity); training-mode dropout
    # would use pltpu.prng_seed + pltpu.prng_random_bits to build a keep-mask.

    # Second matmul for this d_ff chunk, accumulated into the f32 scratch.
    acc_ref[...] += jnp.dot(h.astype(x_ref.dtype), w2_ref[...],
                            preferred_element_type=jnp.float32)

    @pl.when(k == pl.num_programs(1) - 1)
    def _():
        o_ref[...] = (acc_ref[...]
                      + b2_ref[...].astype(jnp.float32)).astype(o_ref.dtype)


def positionwise_feed_forward(x, w1, b1, w2, b2, *,
                              tile_m=256, tile_k=512,
                              vmem_limit_bytes=None):
    """x: (B, S, d_model) -> (B, S, d_model). Weights pre-transposed.

    Dropout is treated as identity (eval mode).
    """
    B, S, d_model = x.shape
    d_ff = w1.shape[1]
    N = B * S

    # Lane-dense padding: last dims to 128-multiples, rows to a tile_m multiple.
    d_model_p = _round_up(d_model, 128)
    d_ff_p = _round_up(d_ff, 128)
    tile_k = min(tile_k, d_ff_p)
    d_ff_p = _round_up(d_ff_p, tile_k)          # make chunking exact
    N_p = _round_up(N, tile_m)

    x2 = jnp.pad(x.reshape(N, d_model),
                 ((0, N_p - N), (0, d_model_p - d_model)))
    w1_p = jnp.pad(w1, ((0, d_model_p - d_model), (0, d_ff_p - d_ff)))
    b1_p = jnp.pad(b1.reshape(1, d_ff), ((0, 0), (0, d_ff_p - d_ff)))
    w2_p = jnp.pad(w2, ((0, d_ff_p - d_ff), (0, d_model_p - d_model)))
    b2_p = jnp.pad(b2.reshape(1, d_model), ((0, 0), (0, d_model_p - d_model)))

    num_row_tiles = N_p // tile_m
    num_k_chunks = d_ff_p // tile_k

    out = pl.pallas_call(
        ffn_kernel,
        out_shape=jax.ShapeDtypeStruct((N_p, d_model_p), x.dtype),
        grid_spec=pltpu.PrefetchScalarGridSpec(
            num_scalar_prefetch=0,
            # rows (parallel) first, d_ff reduction (arbitrary) last
            grid=(num_row_tiles, num_k_chunks),
            in_specs=[
                pl.BlockSpec((tile_m, d_model_p), lambda i, k: (i, 0)),   # x rows
                pl.BlockSpec((d_model_p, tile_k), lambda i, k: (0, k)),   # w1 chunk
                pl.BlockSpec((1, tile_k), lambda i, k: (0, k)),           # b1 chunk
                pl.BlockSpec((tile_k, d_model_p), lambda i, k: (k, 0)),   # w2 chunk
                pl.BlockSpec((1, d_model_p), lambda i, k: (0, 0)),        # b2
            ],
            out_specs=pl.BlockSpec((tile_m, d_model_p), lambda i, k: (i, 0)),
            scratch_shapes=[pltpu.VMEM((tile_m, d_model_p), jnp.float32)],
        ),
        compiler_params=pltpu.CompilerParams(
            dimension_semantics=("parallel", "arbitrary"),
            vmem_limit_bytes=vmem_limit_bytes,
        ),
    )(x2, w1_p, b1_p, w2_p, b2_p)

    return out[:N, :d_model].reshape(B, S, d_model)


if __name__ == "__main__":
    # Small shapes consistent with the module: batch=2, seq=8, d_model=32, d_ff=64
    B, S, d_model, d_ff = 2, 8, 32, 64
    key = jax.random.PRNGKey(0)
    kx, k1, kb1, k2, kb2 = jax.random.split(key, 5)

    x = jax.random.normal(kx, (B, S, d_model), dtype=jnp.float32)

    # Deterministic init mimicking nn.Linear: U(-1/sqrt(fan_in), 1/sqrt(fan_in)).
    lim1 = 1.0 / (d_model ** 0.5)
    lim2 = 1.0 / (d_ff ** 0.5)
    # Stored already transposed relative to PyTorch's (out, in) convention.
    w1 = jax.random.uniform(k1, (d_model, d_ff), jnp.float32, -lim1, lim1)
    b1 = jax.random.uniform(kb1, (d_ff,), jnp.float32, -lim1, lim1)
    w2 = jax.random.uniform(k2, (d_ff, d_model), jnp.float32, -lim2, lim2)
    b2 = jax.random.uniform(kb2, (d_model,), jnp.float32, -lim2, lim2)

    y = positionwise_feed_forward(x, w1, b1, w2, b2)
    y = jax.block_until_ready(y)

    # Pure-JAX reference check (dropout = identity in eval mode).
    ref = jnp.maximum(x @ w1 + b1, 0.0) @ w2 + b2
    assert y.shape == (B, S, d_model)
    assert jnp.allclose(y, ref, atol=1e-5, rtol=1e-5)

    print("KERNEL_OK")
</pallas_src>

<mosaic_0001>
module attributes {stable_mosaic.version = 11 : i64} {
  func.func @ffn_kernel(%arg0: i32, %arg1: i32, %arg2: memref<256x128xf32, #tpu.memory_space<vmem>>, %arg3: memref<128x128xf32, #tpu.memory_space<vmem>>, %arg4: memref<1x128xf32, #tpu.memory_space<vmem>>, %arg5: memref<128x128xf32, #tpu.memory_space<vmem>>, %arg6: memref<1x128xf32, #tpu.memory_space<vmem>>, %arg7: memref<256x128xf32, #tpu.memory_space<vmem>>, %arg8: memref<256x128xf32, #tpu.memory_space<vmem>>) attributes {dimension_semantics = [#tpu.dimension_semantics<parallel>, #tpu.dimension_semantics<arbitrary>], iteration_bounds = array<i64: 1, 1>, scalar_prefetch = 0 : i64, scratch_operands = 1 : i64, tpu.core_type = #tpu.core_type<tc>, window_params = [{transform_indices = @transform_0, window_bounds = array<i64: 256, 128>}, {transform_indices = @transform_1, window_bounds = array<i64: 128, 128>}, {transform_indices = @transform_2, window_bounds = array<i64: 1, 128>}, {transform_indices = @transform_3, window_bounds = array<i64: 128, 128>}, {pipeline_mode = #tpu.pipeline_mode<synchronous>, transform_indices = @transform_4, window_bounds = array<i64: 1, 128>}, {transform_indices = @transform_5, window_bounds = array<i64: 256, 128>}]} {
    %c0_i32 = arith.constant 0 : i32
    %0 = arith.cmpi eq, %arg1, %c0_i32 : i32
    %1 = arith.extui %0 : i1 to i32
    %c0_i32_0 = arith.constant 0 : i32
    %2 = arith.cmpi ne, %1, %c0_i32_0 : i32
    scf.if %2 {
      %cst_16 = arith.constant 0.000000e+00 : f32
      %19 = vector.broadcast %cst_16 : f32 to vector<256x128xf32>
      %c0_17 = arith.constant 0 : index
      %c0_18 = arith.constant 0 : index
      %20 = vector.load %arg8[%c0_17, %c0_18] : memref<256x128xf32, #tpu.memory_space<vmem>>, vector<256x128xf32>
      tpu.vector_store %arg8[%c0_17, %c0_18], %19 {strides = array<i32>} : memref<256x128xf32, #tpu.memory_space<vmem>>, vector<256x128xf32>,
    } else {
    }
    %c0 = arith.constant 0 : index
    %c0_1 = arith.constant 0 : index
    %3 = vector.load %arg2[%c0, %c0_1] : memref<256x128xf32, #tpu.memory_space<vmem>>, vector<256x128xf32>
    %c0_2 = arith.constant 0 : index
    %c0_3 = arith.constant 0 : index
    %4 = vector.load %arg3[%c0_2, %c0_3] : memref<128x128xf32, #tpu.memory_space<vmem>>, vector<128x128xf32>
    %cst = arith.constant dense<0.000000e+00> : vector<256x128xf32>
    %5 = tpu.matmul %3, %4, %cst {dimension_numbers = #tpu.dot_dimension_numbers<[1], [0], [0], [1], [0, 0, 1, 1], [], []>} : vector<256x128xf32>, vector<128x128xf32>, vector<256x128xf32> -> vector<256x128xf32>
    %c0_4 = arith.constant 0 : index
    %c0_5 = arith.constant 0 : index
    %6 = vector.load %arg4[%c0_4, %c0_5] : memref<1x128xf32, #tpu.memory_space<vmem>>, vector<1x128xf32>
    %7 = vector.broadcast %6 : vector<1x128xf32> to vector<256x128xf32>
    %8 = arith.addf %5, %7 : vector<256x128xf32>
    %cst_6 = arith.constant 0.000000e+00 : f32
    %9 = vector.broadcast %cst_6 : f32 to vector<256x128xf32>
    %10 = arith.maximumf %8, %9 : vector<256x128xf32>
    %c0_7 = arith.constant 0 : index
    %c0_8 = arith.constant 0 : index
    %11 = vector.load %arg8[%c0_7, %c0_8] : memref<256x128xf32, #tpu.memory_space<vmem>>, vector<256x128xf32>
    %c0_9 = arith.constant 0 : index
    %c0_10 = arith.constant 0 : index
    %12 = vector.load %arg5[%c0_9, %c0_10] : memref<128x128xf32, #tpu.memory_space<vmem>>, vector<128x128xf32>
    %cst_11 = arith.constant dense<0.000000e+00> : vector<256x128xf32>
    %13 = tpu.matmul %10, %12, %cst_11 {dimension_numbers = #tpu.dot_dimension_numbers<[1], [0], [0], [1], [0, 0, 1, 1], [], []>} : vector<256x128xf32>, vector<128x128xf32>, vector<256x128xf32> -> vector<256x128xf32>
    %14 = arith.addf %11, %13 : vector<256x128xf32>
    %c0_12 = arith.constant 0 : index
    %c0_13 = arith.constant 0 : index
    %15 = vector.load %arg8[%c0_12, %c0_13] : memref<256x128xf32, #tpu.memory_space<vmem>>, vector<256x128xf32>
    tpu.vector_store %arg8[%c0_12, %c0_13], %14 {strides = array<i32>} : memref<256x128xf32, #tpu.memory_space<vmem>>, vector<256x128xf32>,
    %c0_i32_14 = arith.constant 0 : i32
    %16 = arith.cmpi eq, %arg1, %c0_i32_14 : i32
    %17 = arith.extui %16 : i1 to i32
    %c0_i32_15 = arith.constant 0 : i32
    %18 = arith.cmpi ne, %17, %c0_i32_15 : i32
    scf.if %18 {
      %c0_16 = arith.constant 0 : index
      %c0_17 = arith.constant 0 : index
      %19 = vector.load %arg8[%c0_16, %c0_17] : memref<256x128xf32, #tpu.memory_space<vmem>>, vector<256x128xf32>
      %c0_18 = arith.constant 0 : index
      %c0_19 = arith.constant 0 : index
      %20 = vector.load %arg6[%c0_18, %c0_19] : memref<1x128xf32, #tpu.memory_space<vmem>>, vector<1x128xf32>
      %21 = vector.broadcast %20 : vector<1x128xf32> to vector<256x128xf32>
      %22 = arith.addf %19, %21 : vector<256x128xf32>
      %c0_20 = arith.constant 0 : index
      %c0_21 = arith.constant 0 : index
      %23 = vector.load %arg7[%c0_20, %c0_21] : memref<256x128xf32, #tpu.memory_space<vmem>>, vector<256x128xf32>
      tpu.vector_store %arg7[%c0_20, %c0_21], %22 {strides = array<i32>} : memref<256x128xf32, #tpu.memory_space<vmem>>, vector<256x128xf32>,
    } else {
    }
    return
  }
  func.func @transform_0(%arg0: i32, %arg1: i32) -> (i32, i32) {
    %c0_i32 = arith.constant 0 : i32
    %c0_i32_0 = arith.constant 0 : i32
    return %arg0, %c0_i32 : i32, i32
  }
  func.func @transform_1(%arg0: i32, %arg1: i32) -> (i32, i32) {
    %c0_i32 = arith.constant 0 : i32
    %c0_i32_0 = arith.constant 0 : i32
    return %c0_i32, %arg1 : i32, i32
  }
  func.func @transform_2(%arg0: i32, %arg1: i32) -> (i32, i32) {
    %c0_i32 = arith.constant 0 : i32
    %c0_i32_0 = arith.constant 0 : i32
    return %c0_i32, %arg1 : i32, i32
  }
  func.func @transform_3(%arg0: i32, %arg1: i32) -> (i32, i32) {
    %c0_i32 = arith.constant 0 : i32
    %c0_i32_0 = arith.constant 0 : i32
    return %arg1, %c0_i32 : i32, i32
  }
  func.func @transform_4(%arg0: i32, %arg1: i32) -> (i32, i32) {
    %c0_i32 = arith.constant 0 : i32
    %c0_i32_0 = arith.constant 0 : i32
    %c0_i32_1 = arith.constant 0 : i32
    return %c0_i32, %c0_i32_0 : i32, i32
  }
  func.func @transform_5(%arg0: i32, %arg1: i32) -> (i32, i32) {
    %c0_i32 = arith.constant 0 : i32
    %c0_i32_0 = arith.constant 0 : i32
    return %arg0, %c0_i32 : i32, i32
  }
}

</mosaic_0001>

<bundles_post_ra>
// kernel: tpu_custom_call.1
= control target key start
LH: loop header
LB: loop body
LE: loop exit
PB: predicated region body
PF: predicated region fallthrough
CT: control target
= control target key end

     0   :  { %10 = vsyncpa [#allocation4], 0  ;;  %s1355_s0 = inlined_call_operand.hbm [shape: f32[256,128], index: 0, kind: input, shape index: {}]   ;;  %s1356_s1 = inlined_call_operand.hbm [shape: f32[128,128], index: 1, kind: input, shape index: {}]   ;;  %s1357_s2 = inlined_call_operand.vmem [shape: f32[1,128], index: 2, kind: input, shape index: {}]   ;;  %s1358_s3 = inlined_call_operand.hbm [shape: f32[128,128], index: 3, kind: input, shape index: {}]   ;;  %s1359_s4 = inlined_call_operand.vmem [shape: f32[1,128], index: 4, kind: input, shape index: {}]   ;;  %s1360_s5 = inlined_call_operand.hbm [shape: f32[256,128], index: 5, kind: output, shape index: {}]  }
   0x1   :  { %11 = vsyncpa [#allocation7], 0 }
   0x2   :  { %12 = vsyncpa [#allocation5], 0  ;;  %s1221_s18 = smov [#allocation6]   ;;  %s1222_s20 = smov [#allocation3]  }
   0x3   :  { %s30_s19 = sshll.u32 %s1221_s18, 4  ;;  %s18_s21 = sshll.u32 %s1222_s20, 4  ;;  %s31_s19 = int_to_ptr.vmem [resolvable:$true] %s30_s19  ;;  %s19_s21 = int_to_ptr.vmem [resolvable:$true] %s18_s21 }
   0x4   :  { %s1143_s22 = scalar_lea.vmem %s31_s19, 2048  ;;  %p1148_p1 = scmp.lt.s32.totalorder %s31_s19, %s31_s19 }
   0x5   :  { %p1144_p0 = scmp.ne.s32.totalorder %s31_s19, %s1143_s22  ;;  %p1149_p2 = scmp.lt.s32.totalorder %s1143_s22, %s1143_s22 }
   0x7   :  { %p1150_p3 = por %p1149_p2, %p1148_p1 }
   0x9   :  { %p1151_p4 = pnand %p1150_p3, %p1144_p0 }
   0xb   :  { %1154 = shalt.err (!%p1151_p4)
}
   0xc   :  { %s1223_s23 = smov 128   ;;  %s1224_s24 = smov 8  }
   0xd   :  { %36 = dma.hbm_to_vmem [thread:$0]  %s1356_s1, 2048, %s31_s19, [#allocation7], %s1223_s23, %s1223_s23, %s1224_s24  }
   0xe   :  { %s1163_s27 = scalar_lea.vmem %s19_s21, 4096  ;;  %p1168_p6 = scmp.lt.s32.totalorder %s19_s21, %s19_s21 }
   0xf   :  { %p1164_p5 = scmp.ne.s32.totalorder %s19_s21, %s1163_s27  ;;  %p1169_p7 = scmp.lt.s32.totalorder %s1163_s27, %s1163_s27 }
  0x11   :  { %p1170_p8 = por %p1169_p7, %p1168_p6 }
  0x13   :  { %p1171_p9 = pnand %p1170_p8, %p1164_p5 }
  0x15   :  { %1174 = shalt.err (!%p1171_p9)
}
  0x16   :  { %24 = dma.hbm_to_vmem [thread:$0]  %s1355_s0, 4096, %s19_s21, [#allocation4], %s1223_s23, %s1223_s23, %s1224_s24  }
  0x17   :  { %s1225_s30 = smov [#allocation8]  }
  0x18   :  { %s44_s6 = sshll.u32 %s1225_s30, 4  ;;  %s45_s6 = int_to_ptr.vmem [resolvable:$true] %s44_s6 }
  0x19   :  { %s1183_s7 = scalar_lea.vmem %s45_s6, 2048  ;;  %p1188_p11 = scmp.lt.s32.totalorder %s45_s6, %s45_s6 }
  0x1a   :  { %p1184_p10 = scmp.ne.s32.totalorder %s45_s6, %s1183_s7  ;;  %p1189_p12 = scmp.lt.s32.totalorder %s1183_s7, %s1183_s7 }
  0x1c   :  { %p1190_p13 = por %p1189_p12, %p1188_p11 }
  0x1e   :  { %p1191_p0 = pnand %p1190_p13, %p1184_p10 }
  0x20   :  { %1194 = shalt.err (!%p1191_p0)
}
  0x21   :  { %50 = dma.hbm_to_vmem [thread:$0]  %s1358_s3, 2048, %s45_s6, [#allocation7], %s1223_s23, %s1223_s23, %s1224_s24  }
  0x22   :  { %1215 = dma.done.wait [#allocation4], 4096  }
  0x23   :  { %1216 = vsyncadd [#allocation4], 4294963200 }
  0x24   :  { %1217 = dma.done.wait [#allocation7], 4096  }
  0x25   :  { %1218 = vsyncadd [#allocation7], 4294963200  ;;  %v145_v0 = vld [vmem:[#allocation6 + $0x78] sm:$0xff]  ;;  %v144_v1 = vld [vmem:[#allocation6 + $0x70] sm:$0xff] }
  0x26   :  { %969 = vmatprep.subr.mxu0 %v145_v0  ;;  %v143_v2 = vld [vmem:[#allocation6 + $0x68] sm:$0xff]  ;;  %v142_v3 = vld [vmem:[#allocation6 + $0x60] sm:$0xff]  ;;  %v141_v5 = vld [vmem:[#allocation6 + $0x58] sm:$0xff] }
  0x27   :  { %970 = vmatpush3.msra.mxu0 %v145_v0  ;;  %v98_v4 = vld [vmem:[#allocation3] sm:$0xff]  ;;  %v140_v6 = vld [vmem:[#allocation6 + $0x50] sm:$0xff]  ;;  %v139_v7 = vld [vmem:[#allocation6 + $0x48] sm:$0xff] }
  0x28   :  { %971 = vmatprep.subr.mxu0 %v144_v1  ;;  %1001 = vmatprep.mubr.f32.mxu0 %v98_v4  ;;  %v138_v8 = vld [vmem:[#allocation6 + $0x40] sm:$0xff]  ;;  %v137_v9 = vld [vmem:[#allocation6 + $0x38] sm:$0xff]  ;;  %v136_v10 = vld [vmem:[#allocation6 + $0x30] sm:$0xff] }
  0x29   :  { %972 = vmatpush3.msra.mxu0 %v144_v1  ;;  %v457_v11 = vld [vmem:[#allocation8 + $0x78] sm:$0xff]  ;;  %v456_v12 = vld [vmem:[#allocation8 + $0x70] sm:$0xff]  ;;  %v135_v13 = vld [vmem:[#allocation6 + $0x28] sm:$0xff] }
  0x2a   :  { %973 = vmatprep.subr.mxu0 %v143_v2  ;;  %1049 = vmatprep.subr.mxu1 %v457_v11  ;;  %v455_v14 = vld [vmem:[#allocation8 + $0x68] sm:$0xff]  ;;  %v134_v15 = vld [vmem:[#allocation6 + $0x20] sm:$0xff]  ;;  %v133_v17 = vld [vmem:[#allocation6 + $0x18] sm:$0xff] }
  0x2b   :  { %974 = vmatpush3.msra.mxu0 %v143_v2  ;;  %1050 = vmatpush3.msra.mxu1 %v457_v11  ;;  %v454_v16 = vld [vmem:[#allocation8 + $0x60] sm:$0xff]  ;;  %v453_v18 = vld [vmem:[#allocation8 + $0x58] sm:$0xff]  ;;  %v132_v19 = vld [vmem:[#allocation6 + $0x10] sm:$0xff] }
  0x2c   :  { %975 = vmatprep.subr.mxu0 %v142_v3  ;;  %1051 = vmatprep.subr.mxu1 %v456_v12  ;;  %v452_v20 = vld [vmem:[#allocation8 + $0x50] sm:$0xff]  ;;  %v131_v21 = vld [vmem:[#allocation6 + $0x8] sm:$0xff]  ;;  %v130_v23 = vld [vmem:[#allocation6] sm:$0xff] }
  0x2d   :  { %976 = vmatpush3.msra.mxu0 %v142_v3  ;;  %1052 = vmatpush3.msra.mxu1 %v456_v12  ;;  %v451_v22 = vld [vmem:[#allocation8 + $0x48] sm:$0xff]  ;;  %v450_v24 = vld [vmem:[#allocation8 + $0x40] sm:$0xff]  ;;  %v449_v26 = vld [vmem:[#allocation8 + $0x38] sm:$0xff] }
  0x2e   :  { %977 = vmatprep.subr.mxu0 %v141_v5  ;;  %1053 = vmatprep.subr.mxu1 %v455_v14  ;;  %v99_v25 = vld [vmem:[#allocation3 + $0x8] sm:$0xff]  ;;  %v100_v27 = vld [vmem:[#allocation3 + $0x10] sm:$0xff]  ;;  %v101_v29 = vld [vmem:[#allocation3 + $0x18] sm:$0xff] }
  0x2f   :  { %978 = vmatpush3.msra.mxu0 %v141_v5  ;;  %1054 = vmatpush3.msra.mxu1 %v455_v14  ;;  %v448_v28 = vld [vmem:[#allocation8 + $0x30] sm:$0xff]  ;;  %v447_v30 = vld [vmem:[#allocation8 + $0x28] sm:$0xff]  ;;  %v102_v31 = vld [vmem:[#allocation3 + $0x20] sm:$0xff] }
  0x30   :  { %979 = vmatprep.subr.mxu0 %v140_v6  ;;  %1055 = vmatprep.subr.mxu1 %v454_v16  ;;  %v446_v32 = vld [vmem:[#allocation8 + $0x20] sm:$0xff]  ;;  %v103_v33 = vld [vmem:[#allocation3 + $0x28] sm:$0xff]  ;;  %v104_v34 = vld [vmem:[#allocation3 + $0x30] sm:$0xff] }
  0x31   :  { %980 = vmatpush3.msra.mxu0 %v140_v6  ;;  %1056 = vmatpush3.msra.mxu1 %v454_v16  ;;  %v105_v35 = vld [vmem:[#allocation3 + $0x38] sm:$0xff]  ;;  %v106_v36 = vld [vmem:[#allocation3 + $0x40] sm:$0xff]  ;;  %v107_v37 = vld [vmem:[#allocation3 + $0x48] sm:$0xff] }
  0x32   :  { %981 = vmatprep.subr.mxu0 %v139_v7  ;;  %1057 = vmatprep.subr.mxu1 %v453_v18  ;;  %v108_v38 = vld [vmem:[#allocation3 + $0x50] sm:$0xff]  ;;  %v109_v39 = vld [vmem:[#allocation3 + $0x58] sm:$0xff]  ;;  %v110_v40 = vld [vmem:[#allocation3 + $0x60] sm:$0xff] }
  0x33   :  { %982 = vmatpush3.msra.mxu0 %v139_v7  ;;  %1058 = vmatpush3.msra.mxu1 %v453_v18  ;;  %v111_v41 = vld [vmem:[#allocation3 + $0x68] sm:$0xff]  ;;  %v112_v42 = vld [vmem:[#allocation3 + $0x70] sm:$0xff]  ;;  %v113_v43 = vld [vmem:[#allocation3 + $0x78] sm:$0xff] }
  0x34   :  { %983 = vmatprep.subr.mxu0 %v138_v8  ;;  %1059 = vmatprep.subr.mxu1 %v452_v20  ;;  %v114_v44 = vld [vmem:[#allocation3 + $0x80] sm:$0xff]  ;;  %v115_v45 = vld [vmem:[#allocation3 + $0x88] sm:$0xff]  ;;  %v116_v46 = vld [vmem:[#allocation3 + $0x90] sm:$0xff] }
  0x35   :  { %984 = vmatpush3.msra.mxu0 %v138_v8  ;;  %1060 = vmatpush3.msra.mxu1 %v452_v20  ;;  %v117_v47 = vld [vmem:[#allocation3 + $0x98] sm:$0xff]  ;;  %v118_v48 = vld [vmem:[#allocation3 + $0xa0] sm:$0xff]  ;;  %v119_v49 = vld [vmem:[#allocation3 + $0xa8] sm:$0xff] }
  0x36   :  { %985 = vmatprep.subr.mxu0 %v137_v9  ;;  %1061 = vmatprep.subr.mxu1 %v451_v22  ;;  %v120_v50 = vld [vmem:[#allocation3 + $0xb0] sm:$0xff]  ;;  %v121_v51 = vld [vmem:[#allocation3 + $0xb8] sm:$0xff]  ;;  %v122_v52 = vld [vmem:[#allocation3 + $0xc0] sm:$0xff] }
  0x37   :  { %986 = vmatpush3.msra.mxu0 %v137_v9  ;;  %1062 = vmatpush3.msra.mxu1 %v451_v22  ;;  %v123_v53 = vld [vmem:[#allocation3 + $0xc8] sm:$0xff]  ;;  %v124_v54 = vld [vmem:[#allocation3 + $0xd0] sm:$0xff]  ;;  %v125_v55 = vld [vmem:[#allocation3 + $0xd8] sm:$0xff] }
  0x38   :  { %987 = vmatprep.subr.mxu0 %v136_v10  ;;  %1063 = vmatprep.subr.mxu1 %v450_v24  ;;  %v126_v56 = vld [vmem:[#allocation3 + $0xe0] sm:$0xff]  ;;  %v127_v57 = vld [vmem:[#allocation3 + $0xe8] sm:$0xff]  ;;  %v128_v58 = vld [vmem:[#allocation3 + $0xf0] sm:$0xff] }
  0x39   :  { %988 = vmatpush3.msra.mxu0 %v136_v10  ;;  %1064 = vmatpush3.msra.mxu1 %v450_v24  ;;  %v129_v59 = vld [vmem:[#allocation3 + $0xf8] sm:$0xff]  ;;  %v444_v61 = vld [vmem:[#allocation8 + $0x10] sm:$0xff]  ;;  %v443_v62 = vld [vmem:[#allocation8 + $0x8] sm:$0xff] }
  0x3a   :  { %989 = vmatprep.subr.mxu0 %v135_v13  ;;  %1065 = vmatprep.subr.mxu1 %v449_v26  ;;  %v445_v60 = vld [vmem:[#allocation8 + $0x18] sm:$0xff]  ;;  %v442_v63 = vld [vmem:[#allocation8] sm:$0xff] }
  0x3b   :  { %990 = vmatpush3.msra.mxu0 %v135_v13  ;;  %1066 = vmatpush3.msra.mxu1 %v449_v26  ;;  %v1278_v0 = vld [vmem:[%s1357_s2] ss:$0 sm:$0xff] }
  0x3c   :  { %991 = vmatprep.subr.mxu0 %v134_v15  ;;  %1067 = vmatprep.subr.mxu1 %v448_v28 }
  0x3d   :  { %992 = vmatpush3.msra.mxu0 %v134_v15  ;;  %1068 = vmatpush3.msra.mxu1 %v448_v28 }
  0x3e   :  { %993 = vmatprep.subr.mxu0 %v133_v17  ;;  %1069 = vmatprep.subr.mxu1 %v447_v30 }
  0x3f   :  { %994 = vmatpush3.msra.mxu0 %v133_v17  ;;  %1070 = vmatpush3.msra.mxu1 %v447_v30 }
  0x40   :  { %995 = vmatprep.subr.mxu0 %v132_v19  ;;  %1071 = vmatprep.subr.mxu1 %v446_v32 }
  0x41   :  { %996 = vmatpush3.msra.mxu0 %v132_v19  ;;  %1072 = vmatpush3.msra.mxu1 %v446_v32 }
  0x42   :  { %997 = vmatprep.subr.mxu0 %v131_v21  ;;  %1073 = vmatprep.subr.mxu1 %v445_v60 }
  0x43   :  { %998 = vmatpush3.msra.mxu0 %v131_v21  ;;  %1074 = vmatpush3.msra.mxu1 %v445_v60 }
  0x44   :  { %999 = vmatprep.subr.mxu0 %v130_v23  ;;  %1075 = vmatprep.subr.mxu1 %v444_v61 }
  0x45   :  { %1000 = vmatpush3.msra.mxu0 %v130_v23  ;;  %1076 = vmatpush3.msra.mxu1 %v444_v61 }
  0x46   :  { %1002 = vmatmul.mubr.f32.vlgmr.msra.gmra.mxu0 %v99_v25  ;;  %1077 = vmatprep.subr.mxu1 %v443_v62 }
  0x47   :  { %1004 = vmatprep.mubr.f32.mxu0 %v100_v27  ;;  %1078 = vmatpush3.msra.mxu1 %v443_v62 }
  0x48   :  { %1079 = vmatprep.subr.mxu1 %v442_v63 }
  0x49   :  { %1080 = vmatpush3.msra.mxu1 %v442_v63 }
  0x4a   :  { %1005 = vmatmul.mubr.f32.gmra.mxu0 %v101_v29 }
  0x4b   :  { %1007 = vmatprep.mubr.f32.mxu0 %v102_v31 }
  0x4e   :  { %1008 = vmatmul.mubr.f32.gmra.mxu0 %v103_v33 }
  0x4f   :  { %1010 = vmatprep.mubr.f32.mxu0 %v104_v34 }
  0x52   :  { %1011 = vmatmul.mubr.f32.gmra.mxu0 %v105_v35 }
  0x53   :  { %1013 = vmatprep.mubr.f32.mxu0 %v106_v36 }
  0x56   :  { %1014 = vmatmul.mubr.f32.gmra.mxu0 %v107_v37 }
  0x57   :  { %1016 = vmatprep.mubr.f32.mxu0 %v108_v38 }
  0x5a   :  { %1017 = vmatmul.mubr.f32.gmra.mxu0 %v109_v39 }
  0x5b   :  { %1019 = vmatprep.mubr.f32.mxu0 %v110_v40 }
  0x5e   :  { %1020 = vmatmul.mubr.f32.gmra.mxu0 %v111_v41 }
  0x5f   :  { %1022 = vmatprep.mubr.f32.mxu0 %v112_v42 }
  0x62   :  { %1023 = vmatmul.mubr.f32.gmra.mxu0 %v113_v43 }
  0x63   :  { %1025 = vmatprep.mubr.f32.mxu0 %v114_v44 }
  0x66   :  { %1026 = vmatmul.mubr.f32.gmra.mxu0 %v115_v45 }
  0x67   :  { %1028 = vmatprep.mubr.f32.mxu0 %v116_v46 }
  0x6a   :  { %1029 = vmatmul.mubr.f32.gmra.mxu0 %v117_v47 }
  0x6b   :  { %1031 = vmatprep.mubr.f32.mxu0 %v118_v48 }
  0x6e   :  { %1032 = vmatmul.mubr.f32.gmra.mxu0 %v119_v49 }
  0x6f   :  { %1034 = vmatprep.mubr.f32.mxu0 %v120_v50 }
  0x72   :  { %1035 = vmatmul.mubr.f32.gmra.mxu0 %v121_v51 }
  0x73   :  { %1037 = vmatprep.mubr.f32.mxu0 %v122_v52 }
  0x76   :  { %1038 = vmatmul.mubr.f32.gmra.mxu0 %v123_v53 }
  0x77   :  { %1040 = vmatprep.mubr.f32.mxu0 %v124_v54 }
  0x7a   :  { %1041 = vmatmul.mubr.f32.gmra.mxu0 %v125_v55 }
  0x7b   :  { %1043 = vmatprep.mubr.f32.mxu0 %v126_v56 }
  0x7e   :  { %1044 = vmatmul.mubr.f32.gmra.mxu0 %v127_v57 }
  0x7f   :  { %1046 = vmatprep.mubr.f32.mxu0 %v128_v58 }
  0x82   :  { %1047 = vmatmul.mubr.f32.gmra.mxu0 %v129_v59 }
 0x106   :  { %v1003_v1 = vpop.f32.mrf.mxu0 }
 0x107   :  { %v225_v2 = vadd.f32 %v1003_v1, %v1278_v0 }
 0x108   :  { %v219_v3 = vpop.f32.mrf.mxu0 }
 0x109   :  { %v220_v4 = vadd.f32 %v1278_v0, %v219_v3  ;;  %v379_v7 = vmax.f32 %v225_v2, 0.0 }
 0x10a   :  { %v1006_v5 = vpop.f32.mrf.mxu0 }
 0x10b   :  { %v378_v6 = vmax.f32 %v220_v4, 0.0  ;;  %v235_v8 = vadd.f32 %v1006_v5, %v1278_v0 }
 0x10c   :  { %v229_v9 = vpop.f32.mrf.mxu0 }
 0x10d   :  { %v230_v10 = vadd.f32 %v1278_v0, %v229_v9  ;;  %1081 = vmatprep.mubr.f32.mxu1 %v378_v6  ;;  %v381_v13 = vmax.f32 %v235_v8, 0.0 }
 0x10e   :  { %v1009_v11 = vpop.f32.mrf.mxu0  ;;  %1082 = vmatmul.mubr.f32.vlgmr.msra.gmra.mxu1 %v379_v7 }
 0x10f   :  { %v380_v12 = vmax.f32 %v230_v10, 0.0  ;;  %v245_v14 = vadd.f32 %v1009_v11, %v1278_v0 }
 0x110   :  { %v239_v15 = vpop.f32.mrf.mxu0 }
 0x111   :  { %v240_v16 = vadd.f32 %v1278_v0, %v239_v15  ;;  %1084 = vmatprep.mubr.f32.mxu1 %v380_v12  ;;  %v383_v19 = vmax.f32 %v245_v14, 0.0 }
 0x112   :  { %v1012_v17 = vpop.f32.mrf.mxu0  ;;  %1085 = vmatmul.mubr.f32.gmra.mxu1 %v381_v13 }
 0x113   :  { %v382_v18 = vmax.f32 %v240_v16, 0.0  ;;  %v255_v20 = vadd.f32 %v1012_v17, %v1278_v0 }
 0x114   :  { %v249_v21 = vpop.f32.mrf.mxu0 }
 0x115   :  { %v250_v22 = vadd.f32 %v1278_v0, %v249_v21  ;;  %1087 = vmatprep.mubr.f32.mxu1 %v382_v18  ;;  %v385_v25 = vmax.f32 %v255_v20, 0.0 }
 0x116   :  { %v1015_v23 = vpop.f32.mrf.mxu0  ;;  %1088 = vmatmul.mubr.f32.gmra.mxu1 %v383_v19 }
 0x117   :  { %v384_v24 = vmax.f32 %v250_v22, 0.0  ;;  %v265_v26 = vadd.f32 %v1015_v23, %v1278_v0 }
 0x118   :  { %v259_v27 = vpop.f32.mrf.mxu0 }
 0x119   :  { %v260_v28 = vadd.f32 %v1278_v0, %v259_v27  ;;  %1090 = vmatprep.mubr.f32.mxu1 %v384_v24  ;;  %v387_v31 = vmax.f32 %v265_v26, 0.0 }
 0x11a   :  { %v1018_v29 = vpop.f32.mrf.mxu0  ;;  %1091 = vmatmul.mubr.f32.gmra.mxu1 %v385_v25 }
 0x11b   :  { %v386_v30 = vmax.f32 %v260_v28, 0.0  ;;  %v275_v32 = vadd.f32 %v1018_v29, %v1278_v0 }
 0x11c   :  { %v269_v33 = vpop.f32.mrf.mxu0 }
 0x11d   :  { %v270_v34 = vadd.f32 %v1278_v0, %v269_v33  ;;  %1093 = vmatprep.mubr.f32.mxu1 %v386_v30  ;;  %v389_v37 = vmax.f32 %v275_v32, 0.0 }
 0x11e   :  { %v1021_v35 = vpop.f32.mrf.mxu0  ;;  %1094 = vmatmul.mubr.f32.gmra.mxu1 %v387_v31 }
 0x11f   :  { %v388_v36 = vmax.f32 %v270_v34, 0.0  ;;  %v285_v38 = vadd.f32 %v1021_v35, %v1278_v0  ;;  %v1315_v34 = vld [vmem:[%s1359_s4] ss:$0 sm:$0xff]  ;;  %s1226_s4 = smov [#allocation9]  }
 0x120   :  { %v279_v39 = vpop.f32.mrf.mxu0  ;;  %s858_s10 = sshll.u32 %s1226_s4, 4  ;;  %s859_s10 = int_to_ptr.vmem [resolvable:$true] %s858_s10 }
 0x121   :  { %v280_v40 = vadd.f32 %v1278_v0, %v279_v39  ;;  %1096 = vmatprep.mubr.f32.mxu1 %v388_v36  ;;  %v391_v43 = vmax.f32 %v285_v38, 0.0  ;;  %s1195_s11 = scalar_lea.vmem %s859_s10, 4096  ;;  %p1200_p2 = scmp.lt.s32.totalorder %s859_s10, %s859_s10 }
 0x122   :  { %v1024_v41 = vpop.f32.mrf.mxu0  ;;  %1097 = vmatmul.mubr.f32.gmra.mxu1 %v389_v37  ;;  %p1196_p1 = scmp.ne.s32.totalorder %s859_s10, %s1195_s11  ;;  %p1201_p3 = scmp.lt.s32.totalorder %s1195_s11, %s1195_s11 }
 0x123   :  { %v390_v42 = vmax.f32 %v280_v40, 0.0  ;;  %v295_v44 = vadd.f32 %v1024_v41, %v1278_v0 }
 0x124   :  { %v289_v45 = vpop.f32.mrf.mxu0  ;;  %p1202_p4 = por %p1201_p3, %p1200_p2 }
 0x125   :  { %v290_v46 = vadd.f32 %v1278_v0, %v289_v45  ;;  %1099 = vmatprep.mubr.f32.mxu1 %v390_v42  ;;  %v393_v49 = vmax.f32 %v295_v44, 0.0 }
 0x126   :  { %v1027_v47 = vpop.f32.mrf.mxu0  ;;  %1100 = vmatmul.mubr.f32.gmra.mxu1 %v391_v43  ;;  %p1203_p5 = pnand %p1202_p4, %p1196_p1 }
 0x127   :  { %v392_v48 = vmax.f32 %v290_v46, 0.0  ;;  %v305_v50 = vadd.f32 %v1027_v47, %v1278_v0 }
 0x128   :  { %v299_v51 = vpop.f32.mrf.mxu0 }
 0x129   :  { %v300_v52 = vadd.f32 %v1278_v0, %v299_v51  ;;  %1102 = vmatprep.mubr.f32.mxu1 %v392_v48  ;;  %v395_v55 = vmax.f32 %v305_v50, 0.0 }
 0x12a   :  { %v1030_v53 = vpop.f32.mrf.mxu0  ;;  %1103 = vmatmul.mubr.f32.gmra.mxu1 %v393_v49 }
 0x12b   :  { %v394_v54 = vmax.f32 %v300_v52, 0.0  ;;  %v315_v56 = vadd.f32 %v1030_v53, %v1278_v0 }
 0x12c   :  { %v309_v57 = vpop.f32.mrf.mxu0 }
 0x12d   :  { %v310_v58 = vadd.f32 %v1278_v0, %v309_v57  ;;  %1105 = vmatprep.mubr.f32.mxu1 %v394_v54  ;;  %v397_v61 = vmax.f32 %v315_v56, 0.0 }
 0x12e   :  { %v1033_v59 = vpop.f32.mrf.mxu0  ;;  %1106 = vmatmul.mubr.f32.gmra.mxu1 %v395_v55 }
 0x12f   :  { %v396_v60 = vmax.f32 %v310_v58, 0.0  ;;  %v325_v62 = vadd.f32 %v1033_v59, %v1278_v0 }
 0x130   :  { %v319_v63 = vpop.f32.mrf.mxu0 }
 0x131   :  { %v320_v1 = vadd.f32 %v1278_v0, %v319_v63  ;;  %1108 = vmatprep.mubr.f32.mxu1 %v396_v60  ;;  %v399_v4 = vmax.f32 %v325_v62, 0.0 }
 0x132   :  { %v1036_v2 = vpop.f32.mrf.mxu0  ;;  %1109 = vmatmul.mubr.f32.gmra.mxu1 %v397_v61 }
 0x133   :  { %v398_v3 = vmax.f32 %v320_v1, 0.0  ;;  %v335_v5 = vadd.f32 %v1036_v2, %v1278_v0 }
 0x134   :  { %v329_v6 = vpop.f32.mrf.mxu0 }
 0x135   :  { %v330_v7 = vadd.f32 %v1278_v0, %v329_v6  ;;  %1111 = vmatprep.mubr.f32.mxu1 %v398_v3  ;;  %v401_v10 = vmax.f32 %v335_v5, 0.0 }
 0x136   :  { %v1039_v8 = vpop.f32.mrf.mxu0  ;;  %1112 = vmatmul.mubr.f32.gmra.mxu1 %v399_v4 }
 0x137   :  { %v400_v9 = vmax.f32 %v330_v7, 0.0  ;;  %v345_v11 = vadd.f32 %v1039_v8, %v1278_v0 }
 0x138   :  { %v339_v12 = vpop.f32.mrf.mxu0 }
 0x139   :  { %v340_v13 = vadd.f32 %v1278_v0, %v339_v12  ;;  %1114 = vmatprep.mubr.f32.mxu1 %v400_v9  ;;  %v403_v16 = vmax.f32 %v345_v11, 0.0 }
 0x13a   :  { %v1042_v14 = vpop.f32.mrf.mxu0  ;;  %1115 = vmatmul.mubr.f32.gmra.mxu1 %v401_v10 }
 0x13b   :  { %v402_v15 = vmax.f32 %v340_v13, 0.0  ;;  %v355_v17 = vadd.f32 %v1042_v14, %v1278_v0 }
 0x13c   :  { %v349_v18 = vpop.f32.mrf.mxu0 }
 0x13d   :  { %v350_v19 = vadd.f32 %v1278_v0, %v349_v18  ;;  %1117 = vmatprep.mubr.f32.mxu1 %v402_v15  ;;  %v405_v22 = vmax.f32 %v355_v17, 0.0 }
 0x13e   :  { %v1045_v20 = vpop.f32.mrf.mxu0  ;;  %1118 = vmatmul.mubr.f32.gmra.mxu1 %v403_v16 }
 0x13f   :  { %v404_v21 = vmax.f32 %v350_v19, 0.0  ;;  %v365_v23 = vadd.f32 %v1045_v20, %v1278_v0 }
 0x140   :  { %v359_v24 = vpop.f32.mrf.mxu0 }
 0x141   :  { %v360_v25 = vadd.f32 %v1278_v0, %v359_v24  ;;  %1120 = vmatprep.mubr.f32.mxu1 %v404_v21  ;;  %v407_v28 = vmax.f32 %v365_v23, 0.0 }
 0x142   :  { %v1048_v26 = vpop.f32.mrf.mxu0  ;;  %1121 = vmatmul.mubr.f32.gmra.mxu1 %v405_v22 }
 0x143   :  { %v406_v27 = vmax.f32 %v360_v25, 0.0  ;;  %v375_v29 = vadd.f32 %v1048_v26, %v1278_v0 }
 0x144   :  { %v369_v30 = vpop.f32.mrf.mxu0 }
 0x145   :  { %v370_v31 = vadd.f32 %v1278_v0, %v369_v30  ;;  %1123 = vmatprep.mubr.f32.mxu1 %v406_v27  ;;  %v409_v33 = vmax.f32 %v375_v29, 0.0 }
 0x146   :  { %1124 = vmatmul.mubr.f32.gmra.mxu1 %v407_v28 }
 0x147   :  { %v408_v32 = vmax.f32 %v370_v31, 0.0 }
 0x149   :  { %1126 = vmatprep.mubr.f32.mxu1 %v408_v32 }
 0x14a   :  { %1127 = vmatmul.mubr.f32.gmra.mxu1 %v409_v33 }
 0x1ce   :  { %v1083_v35 = vpop.f32.mrf.mxu1 }
 0x1cf   :  { %v790_v36 = vadd.f32 %v1083_v35, %v1315_v34 }
 0x1d0   :  { %v524_v37 = vpop.f32.mrf.mxu1 }
 0x1d1   :  { %822 = vst [vmem:[#allocation9 + $0x8] sm:$0xff] %v790_v36  ;;  %v789_v38 = vadd.f32 %v1315_v34, %v524_v37 }
 0x1d2   :  { %v1086_v39 = vpop.f32.mrf.mxu1 }
 0x1d3   :  { %821 = vst [vmem:[#allocation9] sm:$0xff] %v789_v38  ;;  %v792_v0 = vadd.f32 %v1086_v39, %v1315_v34 }
 0x1d4   :  { %v534_v40 = vpop.f32.mrf.mxu1 }
 0x1d5   :  { %824 = vst [vmem:[#allocation9 + $0x18] sm:$0xff] %v792_v0  ;;  %v791_v41 = vadd.f32 %v1315_v34, %v534_v40 }
 0x1d6   :  { %v1089_v42 = vpop.f32.mrf.mxu1 }
 0x1d7   :  { %823 = vst [vmem:[#allocation9 + $0x10] sm:$0xff] %v791_v41  ;;  %v794_v43 = vadd.f32 %v1089_v42, %v1315_v34 }
 0x1d8   :  { %v544_v44 = vpop.f32.mrf.mxu1 }
 0x1d9   :  { %826 = vst [vmem:[#allocation9 + $0x28] sm:$0xff] %v794_v43  ;;  %v793_v45 = vadd.f32 %v1315_v34, %v544_v44 }
 0x1da   :  { %v1092_v46 = vpop.f32.mrf.mxu1 }
 0x1db   :  { %825 = vst [vmem:[#allocation9 + $0x20] sm:$0xff] %v793_v45  ;;  %v796_v47 = vadd.f32 %v1092_v46, %v1315_v34 }
 0x1dc   :  { %v554_v48 = vpop.f32.mrf.mxu1 }
 0x1dd   :  { %828 = vst [vmem:[#allocation9 + $0x38] sm:$0xff] %v796_v47  ;;  %v795_v49 = vadd.f32 %v1315_v34, %v554_v48 }
 0x1de   :  { %v1095_v50 = vpop.f32.mrf.mxu1 }
 0x1df   :  { %827 = vst [vmem:[#allocation9 + $0x30] sm:$0xff] %v795_v49  ;;  %v798_v51 = vadd.f32 %v1095_v50, %v1315_v34 }
 0x1e0   :  { %v564_v52 = vpop.f32.mrf.mxu1 }
 0x1e1   :  { %830 = vst [vmem:[#allocation9 + $0x48] sm:$0xff] %v798_v51  ;;  %v797_v53 = vadd.f32 %v1315_v34, %v564_v52 }
 0x1e2   :  { %v1098_v54 = vpop.f32.mrf.mxu1 }
 0x1e3   :  { %829 = vst [vmem:[#allocation9 + $0x40] sm:$0xff] %v797_v53  ;;  %v800_v55 = vadd.f32 %v1098_v54, %v1315_v34 }
 0x1e4   :  { %v574_v56 = vpop.f32.mrf.mxu1 }
 0x1e5   :  { %832 = vst [vmem:[#allocation9 + $0x58] sm:$0xff] %v800_v55  ;;  %v799_v57 = vadd.f32 %v1315_v34, %v574_v56 }
 0x1e6   :  { %v1101_v58 = vpop.f32.mrf.mxu1 }
 0x1e7   :  { %831 = vst [vmem:[#allocation9 + $0x50] sm:$0xff] %v799_v57  ;;  %v802_v59 = vadd.f32 %v1101_v58, %v1315_v34 }
 0x1e8   :  { %v584_v60 = vpop.f32.mrf.mxu1 }
 0x1e9   :  { %834 = vst [vmem:[#allocation9 + $0x68] sm:$0xff] %v802_v59  ;;  %v801_v61 = vadd.f32 %v1315_v34, %v584_v60 }
 0x1ea   :  { %v1104_v62 = vpop.f32.mrf.mxu1 }
 0x1eb   :  { %833 = vst [vmem:[#allocation9 + $0x60] sm:$0xff] %v801_v61  ;;  %v804_v63 = vadd.f32 %v1104_v62, %v1315_v34 }
 0x1ec   :  { %v594_v1 = vpop.f32.mrf.mxu1 }
 0x1ed   :  { %836 = vst [vmem:[#allocation9 + $0x78] sm:$0xff] %v804_v63  ;;  %v803_v2 = vadd.f32 %v1315_v34, %v594_v1 }
 0x1ee   :  { %v1107_v3 = vpop.f32.mrf.mxu1 }
 0x1ef   :  { %835 = vst [vmem:[#allocation9 + $0x70] sm:$0xff] %v803_v2  ;;  %v806_v4 = vadd.f32 %v1107_v3, %v1315_v34 }
 0x1f0   :  { %v604_v5 = vpop.f32.mrf.mxu1 }
 0x1f1   :  { %838 = vst [vmem:[#allocation9 + $0x88] sm:$0xff] %v806_v4  ;;  %v805_v6 = vadd.f32 %v1315_v34, %v604_v5 }
 0x1f2   :  { %v1110_v7 = vpop.f32.mrf.mxu1 }
 0x1f3   :  { %837 = vst [vmem:[#allocation9 + $0x80] sm:$0xff] %v805_v6  ;;  %v808_v8 = vadd.f32 %v1110_v7, %v1315_v34 }
 0x1f4   :  { %v614_v9 = vpop.f32.mrf.mxu1 }
 0x1f5   :  { %840 = vst [vmem:[#allocation9 + $0x98] sm:$0xff] %v808_v8  ;;  %v807_v10 = vadd.f32 %v1315_v34, %v614_v9 }
 0x1f6   :  { %v1113_v11 = vpop.f32.mrf.mxu1 }
 0x1f7   :  { %839 = vst [vmem:[#allocation9 + $0x90] sm:$0xff] %v807_v10  ;;  %v810_v12 = vadd.f32 %v1113_v11, %v1315_v34 }
 0x1f8   :  { %v624_v13 = vpop.f32.mrf.mxu1 }
 0x1f9   :  { %842 = vst [vmem:[#allocation9 + $0xa8] sm:$0xff] %v810_v12  ;;  %v809_v14 = vadd.f32 %v1315_v34, %v624_v13 }
 0x1fa   :  { %v1116_v15 = vpop.f32.mrf.mxu1 }
 0x1fb   :  { %841 = vst [vmem:[#allocation9 + $0xa0] sm:$0xff] %v809_v14  ;;  %v812_v16 = vadd.f32 %v1116_v15, %v1315_v34 }
 0x1fc   :  { %v634_v17 = vpop.f32.mrf.mxu1 }
 0x1fd   :  { %844 = vst [vmem:[#allocation9 + $0xb8] sm:$0xff] %v812_v16  ;;  %v811_v18 = vadd.f32 %v1315_v34, %v634_v17 }
 0x1fe   :  { %v1119_v19 = vpop.f32.mrf.mxu1 }
 0x1ff   :  { %843 = vst [vmem:[#allocation9 + $0xb0] sm:$0xff] %v811_v18  ;;  %v814_v20 = vadd.f32 %v1119_v19, %v1315_v34 }
 0x200   :  { %v644_v21 = vpop.f32.mrf.mxu1 }
 0x201   :  { %846 = vst [vmem:[#allocation9 + $0xc8] sm:$0xff] %v814_v20  ;;  %v813_v22 = vadd.f32 %v1315_v34, %v644_v21 }
 0x202   :  { %v1122_v23 = vpop.f32.mrf.mxu1 }
 0x203   :  { %845 = vst [vmem:[#allocation9 + $0xc0] sm:$0xff] %v813_v22  ;;  %v816_v24 = vadd.f32 %v1122_v23, %v1315_v34 }
 0x204   :  { %v654_v25 = vpop.f32.mrf.mxu1 }
 0x205   :  { %848 = vst [vmem:[#allocation9 + $0xd8] sm:$0xff] %v816_v24  ;;  %v815_v26 = vadd.f32 %v1315_v34, %v654_v25 }
 0x206   :  { %v1125_v27 = vpop.f32.mrf.mxu1 }
 0x207   :  { %847 = vst [vmem:[#allocation9 + $0xd0] sm:$0xff] %v815_v26  ;;  %v818_v28 = vadd.f32 %v1125_v27, %v1315_v34 }
 0x208   :  { %v664_v29 = vpop.f32.mrf.mxu1 }
 0x209   :  { %850 = vst [vmem:[#allocation9 + $0xe8] sm:$0xff] %v818_v28  ;;  %v817_v30 = vadd.f32 %v1315_v34, %v664_v29 }
 0x20a   :  { %v1128_v31 = vpop.f32.mrf.mxu1 }
 0x20b   :  { %849 = vst [vmem:[#allocation9 + $0xe0] sm:$0xff] %v817_v30  ;;  %v820_v32 = vadd.f32 %v1128_v31, %v1315_v34 }
 0x20c   :  { %v674_v33 = vpop.f32.mrf.mxu1 }
 0x20d   :  { %852 = vst [vmem:[#allocation9 + $0xf8] sm:$0xff] %v820_v32  ;;  %v819_v35 = vadd.f32 %v1315_v34, %v674_v33 }
 0x20f   :  { %851 = vst [vmem:[#allocation9 + $0xf0] sm:$0xff] %v819_v35 }
 0x210   :  { %1206 = shalt.err (!%p1203_p5)
}
 0x211   :  { %864 = dma.vmem_to_hbm [thread:$0]  %s859_s10, 4096, %s1360_s5, [#allocation5], %s1223_s23, %s1223_s23, %s1224_s24  }
 0x212   :  { %1219 = dma.done.wait [#allocation5], 4096  }
 0x213   :  { %1220 = vsyncadd [#allocation5], 4294963200 }
 0x214   :  { %868 = vsyncpa [#allocation4], 1 }
 0x215   :  { %869 = vsyncpa [#allocation7], 1 }
 0x216   :  { %870 = vsyncpa [#allocation5], 1 }

</bundles_post_ra>
